<compile_context>
chip_gen: v7x
topology: tpu7x:2x2x1
jax: 0.10.0
libtpu: 0.0.40
codegen_flags: <defaults>
</compile_context>

<pallas_src>
import functools

import jax
import jax.numpy as jnp
import numpy as np
from jax.experimental import pallas as pl
from jax.experimental.pallas import tpu as pltpu

_MIB = 1024 * 1024


def _round_up(x, m):
    return (x + m - 1) // m * m


def _tpu_params():
    """(vmem_capacity_bytes, mxu_align, num_tensorcores) with safe fallbacks."""
    vmem_cap = 128 * _MIB
    mxu_align = 256
    num_cores = 1
    try:
        kind = (jax.devices()[0].device_kind or "").lower()
        if "v5 lite" in kind or "v5e" in kind or "v5litepod" in kind:
            mxu_align = 128          # v5e MXU is 4x128x128
        if "v7" in kind:
            num_cores = 2            # 2 TensorCores / chip
            vmem_cap = 64 * _MIB     # per-TC VMEM
    except Exception:
        pass
    try:
        vmem_cap = int(pltpu.get_tpu_info().vmem_capacity_bytes)
    except Exception:
        pass
    return vmem_cap, mxu_align, num_cores


def _choose_tile(dim, cap, align):
    """Whole dim if it fits under the cap, else the largest multiple of
    `align` <= cap; the caller pads the dim up to a multiple of the tile."""
    if dim <= cap:
        return dim
    return max(align, (cap // align) * align)


def _mm_kernel_single_k(x_ref, w_ref, o_ref):
    # No K split across the grid: dot straight into the output tile.
    o_ref[...] = jnp.dot(
        x_ref[...], w_ref[...], preferred_element_type=jnp.float32
    ).astype(o_ref.dtype)


def _mm_kernel_multi_k_out_acc(x_ref, w_ref, o_ref):
    # The f32 output tile is resident across the (last, "arbitrary") K axis:
    # accumulate straight into it — no scratch, no final copy/cast.
    @pl.when(pl.program_id(2) == 0)
    def _():
        o_ref[...] = jnp.zeros_like(o_ref)

    o_ref[...] += jnp.dot(
        x_ref[...], w_ref[...], preferred_element_type=jnp.float32
    )


def _mm_kernel_multi_k_scratch(x_ref, w_ref, o_ref, acc_ref):
    # Non-f32 outputs: accumulate in f32 VMEM scratch, cast once at the end.
    @pl.when(pl.program_id(2) == 0)
    def _():
        acc_ref[...] = jnp.zeros_like(acc_ref)

    acc_ref[...] += jnp.dot(
        x_ref[...], w_ref[...], preferred_element_type=jnp.float32
    )

    @pl.when(pl.program_id(2) == pl.num_programs(2) - 1)
    def _():
        o_ref[...] = acc_ref[...].astype(o_ref.dtype)


@functools.partial(
    jax.jit, static_argnames=("tm", "tn", "tk", "bf16_inputs", "force_pallas")
)
def matmul_pallas(x, w, *, tm=None, tn=None, tk=None, bf16_inputs=False,
                  force_pallas=False):
    """out = x @ w  (same semantics as torch.mm)."""
    M, K = x.shape
    K2, N = w.shape
    if K != K2:
        raise ValueError(f"inner dims must match: {K} vs {K2}")
    out_dtype = jnp.result_type(x.dtype, w.dtype)

    # Small-problem fast path: launch-latency-bound shapes (like the module's
    # 8x32x16) are strictly cheaper as a plain XLA dot (no pad/slice ops).
    if not force_pallas and (M * N * K) <= (1 << 18):
        return jnp.dot(x, w, preferred_element_type=out_dtype)

    vmem_cap, mxu_align, num_cores = _tpu_params()
    big_vmem = vmem_cap >= 96 * _MIB
    cap_mn = 1024
    cap_k = 2048 if big_vmem else 1024

    # Optional mixed precision: bf16 operands, f32 MXU accumulation.
    if bf16_inputs:
        x = x.astype(jnp.bfloat16)
        w = w.astype(jnp.bfloat16)
    sub_align = 16 if bf16_inputs else 8   # native sublane packing

    # --- Tile selection + pad-to-tile (zero padding is a no-op for the dot).
    tm_auto, tn_auto = tm is None, tn is None
    Mp = _round_up(M, sub_align)
    if tm is None:
        tm = _choose_tile(Mp, cap_mn, mxu_align)
    Mp = _round_up(Mp, tm)

    Np = _round_up(N, 128)                 # lane-dense output -> unmasked vst
    if tn is None:
        tn = _choose_tile(Np, cap_mn, mxu_align)
    Np = _round_up(Np, tn)

    if tk is None:
        tk = _choose_tile(K, cap_k, mxu_align)
    Kp = _round_up(K, tk)

    # v7x megacore: make sure both TensorCores get parallel grid steps.
    if num_cores >= 2 and (Mp // tm) * (Np // tn) == 1:
        if tn_auto and tn >= 256 and (tn // 2) % 128 == 0:
            tn //= 2
        elif tm_auto and tm >= 2 * sub_align and (tm // 2) % sub_align == 0:
            tm //= 2

    # (8,128) tiling legality: each block dim aligned or full-extent.
    if not (tm == Mp or tm % 8 == 0):
        raise ValueError(f"tm={tm} must be a multiple of 8 or equal {Mp}")
    if not (tk == Kp or tk % 128 == 0):
        raise ValueError(f"tk={tk} must be a multiple of 128 or equal {Kp}")
    if not (tn == Np or tn % 128 == 0):
        raise ValueError(f"tn={tn} must be a multiple of 128 or equal {Np}")

    # Zero-pad operands to the padded problem size.
    if Mp != M or Kp != K:
        x = jnp.pad(x, ((0, Mp - M), (0, Kp - K)))
    if Kp != K or Np != N:
        w = jnp.pad(w, ((0, Kp - K), (0, Np - N)))

    gm, gn, gk = Mp // tm, Np // tn, Kp // tk
    acc_into_out = out_dtype == jnp.float32

    # VMEM budget: double-buffered tiles (+ scratch acc if needed) + 25%.
    in_bytes = jnp.dtype(x.dtype).itemsize
    out_bytes = jnp.dtype(out_dtype).itemsize
    footprint = (2 * (tm * tk + tk * tn) * in_bytes
                 + 2 * tm * tn * out_bytes
                 + (tm * tn * 4 if (gk > 1 and not acc_into_out) else 0))
    vmem_budget = min(100 * _MIB, int(vmem_cap * 0.75))
    vmem_limit = int(min(vmem_budget, max(16 * _MIB, footprint * 5 // 4)))

    cost = pl.CostEstimate(
        flops=2 * Mp * Np * Kp,
        transcendentals=0,
        bytes_accessed=in_bytes * (Mp * Kp + Kp * Np) + out_bytes * Mp * Np,
    )

    if gk == 1:
        grid = (gm, gn)
        kernel = _mm_kernel_single_k
        in_specs = [
            pl.BlockSpec((tm, tk), lambda i, j: (i, 0)),
            pl.BlockSpec((tk, tn), lambda i, j: (0, j)),
        ]
        out_specs = pl.BlockSpec((tm, tn), lambda i, j: (i, j))
        scratch_shapes = []
        dims = ("parallel", "parallel")
    else:
        grid = (gm, gn, gk)
        kernel = (_mm_kernel_multi_k_out_acc if acc_into_out
                  else _mm_kernel_multi_k_scratch)
        in_specs = [
            pl.BlockSpec((tm, tk), lambda i, j, k: (i, k)),
            pl.BlockSpec((tk, tn), lambda i, j, k: (k, j)),
        ]
        out_specs = pl.BlockSpec((tm, tn), lambda i, j, k: (i, j))
        scratch_shapes = ([] if acc_into_out
                          else [pltpu.VMEM((tm, tn), jnp.float32)])
        dims = ("parallel", "parallel", "arbitrary")

    out_padded = pl.pallas_call(
        kernel,
        out_shape=jax.ShapeDtypeStruct((Mp, Np), out_dtype),
        grid_spec=pltpu.PrefetchScalarGridSpec(
            num_scalar_prefetch=0,
            grid=grid,
            in_specs=in_specs,
            out_specs=out_specs,
            scratch_shapes=scratch_shapes,
        ),
        compiler_params=pltpu.CompilerParams(
            dimension_semantics=dims,
            vmem_limit_bytes=vmem_limit,
        ),
        cost_estimate=cost,
    )(x, w)

    if Mp != M or Np != N:
        return out_padded[:M, :N]
    return out_padded


class MatMulPallas:
    """Module-equivalent of MatMulPT: the weight is pre-padded once to a
    lane-dense (K, round_up(N, 128)) layout (and optionally pre-cast to bf16)
    so no per-call pad/cast op is emitted; forward is x @ W."""

    def __init__(self, weights, *, bf16_inputs=False):
        _, N = weights.shape
        self.out_dim = N
        w = weights.astype(jnp.bfloat16) if bf16_inputs else weights
        Np = _round_up(N, 128)
        if Np != N:
            w = jnp.pad(w, ((0, 0), (0, Np - N)))
        self.weights_padded = w
        self.bf16_inputs = bf16_inputs

    def __call__(self, x, **kwargs):
        y = matmul_pallas(x, self.weights_padded,
                          bf16_inputs=self.bf16_inputs, **kwargs)
        if y.shape[1] != self.out_dim:
            y = y[:, :self.out_dim]
        return y


if __name__ == "__main__":
    # MatMulPT(input_dim=32, output_dim=16) applied to x of shape (8, 32).
    input_dim, output_dim, batch = 32, 16, 8

    key = jax.random.PRNGKey(0)
    kx, kw, kx2, kw2 = jax.random.split(key, 4)
    x = jax.random.normal(kx, (batch, input_dim), dtype=jnp.float32)
    # nn.Parameter(torch.randn(input_dim, output_dim)) — deterministic init.
    weights = jax.random.normal(kw, (input_dim, output_dim), dtype=jnp.float32)

    # 1) Pallas kernel at the module shape (single-K path, lane-padded output).
    out = matmul_pallas(x, weights, force_pallas=True)
    jax.block_until_ready(out)
    ref = x @ weights
    assert out.shape == (batch, output_dim)
    assert jnp.allclose(out, ref, atol=1e-5, rtol=1e-5), "mismatch (single-K)"

    # 2) Module-equivalent wrapper: weight pre-padded once; the tiny shape
    #    takes the small-problem fast path (still exact torch.mm semantics).
    mm = MatMulPallas(weights)
    out2 = mm(x)
    jax.block_until_ready(out2)
    assert out2.shape == (batch, output_dim)
    assert jnp.allclose(out2, ref, atol=1e-5, rtol=1e-5), "mismatch (wrapper)"

    # 3) Multi-K path + pad-to-tile: K=300 and N=200 are not tile multiples;
    #    with tk=128 the K axis is split and the kernel accumulates directly
    #    into the resident f32 output tile.
    x2 = jax.random.normal(kx2, (8, 300), dtype=jnp.float32)
    w2 = jax.random.normal(kw2, (300, 200), dtype=jnp.float32)
    out3 = matmul_pallas(x2, w2, tk=128, force_pallas=True)
    jax.block_until_ready(out3)
    ref3 = np.asarray(x2, dtype=np.float64) @ np.asarray(w2, dtype=np.float64)
    assert out3.shape == (8, 200)
    assert np.allclose(np.asarray(out3, dtype=np.float64), ref3,
                       atol=1e-2, rtol=1e-3), "mismatch (multi-K)"

    print("KERNEL_OK")
</pallas_src>

<mosaic_0001>
module attributes {stable_mosaic.version = 11 : i64} {
  func.func @_mm_kernel_single_k(%arg0: i32, %arg1: i32, %arg2: memref<8x32xf32, #tpu.memory_space<vmem>>, %arg3: memref<32x128xf32, #tpu.memory_space<vmem>>, %arg4: memref<8x128xf32, #tpu.memory_space<vmem>>) attributes {dimension_semantics = [#tpu.dimension_semantics<parallel>, #tpu.dimension_semantics<parallel>], iteration_bounds = array<i64: 1, 1>, scalar_prefetch = 0 : i64, scratch_operands = 0 : i64, tpu.core_type = #tpu.core_type<tc>, window_params = [{transform_indices = @transform_0, window_bounds = array<i64: 8, 32>}, {transform_indices = @transform_1, window_bounds = array<i64: 32, 128>}, {transform_indices = @transform_2, window_bounds = array<i64: 8, 128>}]} {
    %c0 = arith.constant 0 : index
    %c0_0 = arith.constant 0 : index
    %0 = vector.load %arg2[%c0, %c0_0] : memref<8x32xf32, #tpu.memory_space<vmem>>, vector<8x32xf32>
    %c0_1 = arith.constant 0 : index
    %c0_2 = arith.constant 0 : index
    %1 = vector.load %arg3[%c0_1, %c0_2] : memref<32x128xf32, #tpu.memory_space<vmem>>, vector<32x128xf32>
    %cst = arith.constant dense<0.000000e+00> : vector<8x128xf32>
    %2 = tpu.matmul %0, %1, %cst {dimension_numbers = #tpu.dot_dimension_numbers<[1], [0], [0], [1], [0, 0, 1, 1], [], []>} : vector<8x32xf32>, vector<32x128xf32>, vector<8x128xf32> -> vector<8x128xf32>
    %c0_3 = arith.constant 0 : index
    %c0_4 = arith.constant 0 : index
    %3 = vector.load %arg4[%c0_3, %c0_4] : memref<8x128xf32, #tpu.memory_space<vmem>>, vector<8x128xf32>
    tpu.vector_store %arg4[%c0_3, %c0_4], %2 {strides = array<i32>} : memref<8x128xf32, #tpu.memory_space<vmem>>, vector<8x128xf32>,
    return
  }
  func.func @transform_0(%arg0: i32, %arg1: i32) -> (i32, i32) {
    %c0_i32 = arith.constant 0 : i32
    %c0_i32_0 = arith.constant 0 : i32
    return %arg0, %c0_i32 : i32, i32
  }
  func.func @transform_1(%arg0: i32, %arg1: i32) -> (i32, i32) {
    %c0_i32 = arith.constant 0 : i32
    %c0_i32_0 = arith.constant 0 : i32
    return %c0_i32, %arg1 : i32, i32
  }
  func.func @transform_2(%arg0: i32, %arg1: i32) -> (i32, i32) {
    %c0_i32 = arith.constant 0 : i32
    return %arg0, %arg1 : i32, i32
  }
}

</mosaic_0001>

<bundles_post_ra>
// kernel: matmul_pallas.1
= control target key start
LH: loop header
LB: loop body
LE: loop exit
PB: predicated region body
PF: predicated region fallthrough
CT: control target
= control target key end

     0   :  { %v157_v3 = vmov 0.0|0.0   ;;  %vm158_vm0 = vmmov 0   ;;  %v159_v6 = vmov 0.0   ;;  %s203_s0 = inlined_call_operand.vmem [shape: f32[8,32], index: 0, kind: input, shape index: {}]   ;;  %s204_s1 = inlined_call_operand.vmem [shape: f32[32,128], index: 1, kind: input, shape index: {}]   ;;  %s205_s2 = inlined_call_operand.hbm [shape: f32[8,128], index: 2, kind: output, shape index: {}]  }
   0x1   :  { %v13_v0 = vld [vmem:[%s204_s1] sm:$0xff]  ;;  %v14_v1 = vld [vmem:[%s204_s1 + $0x8] sm:$0xff]  ;;  %v15_v2 = vld [vmem:[%s204_s1 + $0x10] sm:$0xff]  ;;  %123 = vmatprep.subr.bf16.mxu0 %v157_v3  ;;  %120 = vmatprep.mubr.msk.f32.mxu0 %vm158_vm0, %v159_v6 }
   0x2   :  { %v124_v4 = vpack.c.bf16 %v14_v1, %v13_v0  ;;  %v16_v5 = vld [vmem:[%s204_s1 + $0x18] sm:$0xff] }
   0x3   :  { %7 = vsyncpa [#allocation3], 0  ;;  %v127_v7 = vpack.c.bf16 %v16_v5, %v15_v2  ;;  %v12_v8 = vld [vmem:[%s203_s0] sm:$0xff]  ;;  %vm17_vm1 = vcmask 261120   ;;  %s160_s19 = smov [#allocation2]  }
   0x4   :  { %125 = vmatpush3.bf16.msra.mxu0 %v124_v4  ;;  %s98_s20 = sshll.u32 %s160_s19, 4  ;;  %s99_s20 = int_to_ptr.vmem [resolvable:$true] %s98_s20 }
   0x5   :  { %126 = vmatprep.subr.bf16.mxu0 %v157_v3  ;;  %s133_s1 = scalar_lea.vmem %s99_s20, 128  ;;  %p138_p1 = scmp.lt.s32.totalorder %s99_s20, %s99_s20 }
   0x6   :  { %p134_p0 = scmp.ne.s32.totalorder %s99_s20, %s133_s1  ;;  %p139_p2 = scmp.lt.s32.totalorder %s133_s1, %s133_s1 }
   0x8   :  { %128 = vmatpush3.bf16.msra.mxu0 %v127_v7  ;;  %p140_p3 = por %p139_p2, %p138_p1 }
   0xa   :  { %p141_p4 = pnand %p140_p3, %p134_p0 }
   0xb   :  { %121 = vmatmul.mubr.msk.f32.vlgmr.msra.gmra.mrb[0].mxu0 %vm17_vm1, %v12_v8 }
  0xde   :  { %v87_v9 = vpop.f32.mrb[0].mxu0 }
  0xdf   :  { %91 = vst [vmem:[#allocation2] sm:$0xff] %v87_v9  ;;  %v122_v10 = vpop.f32.mrb[1].mxu0 }
  0xe0   :  { %144 = shalt.err (!%p141_p4)
}
  0xe1   :  { %s145_s23 = scalar_lea.hbm %s205_s2, 128 }
  0xe2   :  { %p146_p5 = scmp.ne.s32.totalorder %s205_s2, %s145_s23  ;;  %p149_p6 = scmp.lt.u32.totalorder %s145_s23, %s205_s2 }
  0xe4   :  { %p151_p7 = pnand %p149_p6, %p146_p5 }
  0xe6   :  { %154 = shalt.err (!%p151_p7)
}
  0xe7   :  { %101 = dma.vmem_to_hbm [thread:$0]  %s99_s20, 128, %s205_s2, [#allocation3]  }
  0xe8   :  { %155 = dma.done.wait [#allocation3], 128  }
  0xe9   :  { %156 = vsyncadd [#allocation3], 4294967168 }
  0xea   :  { %105 = vsyncpa [#allocation3], 1 }

</bundles_post_ra>
